<compile_context>
chip_gen: v6e
topology: v6e:2x2x1
jax: 0.10.0
libtpu: 0.0.40
codegen_flags: <defaults>
</compile_context>

<pallas_src>
import functools

import jax
import jax.numpy as jnp
from jax import lax
from jax.experimental import pallas as pl
from jax.experimental.pallas import tpu as pltpu


def _linear_kernel(x_ref, w_ref, b_ref, o_ref, acc_ref):
    # x: [tm, tk] bf16, w: [tk, tn] bf16 (pre-transposed in wrapper),
    # b: [1, tn] f32, o: [tm, tn], acc: [tm, tn] f32.
    k = pl.program_id(2)

    @pl.when(k == 0)
    def _():
        acc_ref[...] = jnp.zeros_like(acc_ref)

    acc_ref[...] += jnp.dot(
        x_ref[...], w_ref[...], preferred_element_type=jnp.float32)

    @pl.when(k == pl.num_programs(2) - 1)
    def _():
        o_ref[...] = (acc_ref[...] + b_ref[...]).astype(o_ref.dtype)


def _vmem_capacity_bytes():
    try:
        return int(pltpu.get_tpu_info().vmem_capacity_bytes)
    except Exception:
        # Conservative fallback (v7x-sized) if the query is unavailable.
        return 64 * 1024 * 1024


def _choose_tiles(M, K, N, vmem_limit, out_itemsize):
    """Pick (tm, tn, tk) for bf16 operands under the VMEM limit."""
    tn = min(512, N)
    # Big parts (128 MiB VMEM) can afford tm=2048; v7x (64 MiB) targets 1024.
    tm_target = 2048 if vmem_limit > 64 * 1024 * 1024 else 1024
    tm = min(tm_target, M)

    budget = vmem_limit // 4  # leave room for W/out double buffers + acc

    def x_tile_bytes(tm_, tk_):
        return 2 * tm_ * tk_ * 2  # double-buffered bf16

    # Whole K unless the x tile would blow the budget; only tile K with an
    # exact divisor so no padded-K garbage is accumulated into valid outputs.
    tk = K
    if x_tile_bytes(tm, tk) > budget:
        for cand in (1024, 512, 256):
            if K % cand == 0 and cand < K:
                tk = cand
                break
    # If K could not be tiled (no divisor), shrink tm instead.
    while tm > 256 and x_tile_bytes(tm, tk) > budget:
        tm = max(256, tm // 2)

    del out_itemsize  # output tile is small relative to budget at these sizes
    return tm, tn, tk


@functools.partial(jax.jit, static_argnames=("tm", "tn", "tk", "out_dtype"))
def worker_module_forward(x, weight, bias, *, tm=None, tn=None, tk=None,
                          out_dtype=None):
    """Equivalent of WorkerModule.forward(x_rref) -> local_net(x).

    x:      [B, S, H_in]
    weight: [H_out, H_in]  (torch nn.Linear layout)
    bias:   [H_out]
    """
    B, S, H_in = x.shape
    H_out, H_in_w = weight.shape
    assert H_in_w == H_in, "weight in_features must match x hidden dim"

    M, K, N = B * S, H_in, H_out
    out_dtype = out_dtype or x.dtype
    out_itemsize = jnp.dtype(out_dtype).itemsize

    vmem_cap = _vmem_capacity_bytes()
    vmem_limit = min(int(vmem_cap * 3 // 4), 100 * 1024 * 1024)

    tm_c, tn_c, tk_c = _choose_tiles(M, K, N, vmem_limit, out_itemsize)
    tm = min(tm or tm_c, M)
    tn = min(tn or tn_c, N)
    tk = min(tk or tk_c, K)
    if K % tk != 0:          # never allow a padded partial K tile
        tk = K

    # One-time operand prep (in real deployment the bf16 / transposed weight
    # would be materialized at parameter-load time, not per forward call).
    x2d = x.reshape(M, K).astype(jnp.bfloat16)
    w_t = weight.T.astype(jnp.bfloat16)          # [H_in, H_out]
    b2d = bias.reshape(1, N).astype(jnp.float32)

    gm, gn, gk = pl.cdiv(M, tm), pl.cdiv(N, tn), pl.cdiv(K, tk)

    # v7x has 2 TensorCores: make sure the leading "parallel" axis has >1
    # tiles when possible (small-M calls put the N axis first).
    m_major = not (gm == 1 and gn > 1)
    if m_major:
        grid = (gm, gn, gk)
        x_map = lambda i, j, k: (i, k)
        w_map = lambda i, j, k: (k, j)
        b_map = lambda i, j, k: (0, j)
        o_map = lambda i, j, k: (i, j)
    else:
        grid = (gn, gm, gk)
        x_map = lambda j, i, k: (i, k)
        w_map = lambda j, i, k: (k, j)
        b_map = lambda j, i, k: (0, j)
        o_map = lambda j, i, k: (i, j)

    cost = pl.CostEstimate(
        flops=2 * M * K * N,
        transcendentals=0,
        bytes_accessed=(
            M * K * 2 * (gn if gk > 1 else 1)   # x (re-read per N tile if K tiled)
            + K * N * 2 * gm                    # weight re-streamed per M tile
            + N * 4 * gn                        # bias
            + M * N * out_itemsize),            # output writeback
    )

    out2d = pl.pallas_call(
        _linear_kernel,
        out_shape=jax.ShapeDtypeStruct((M, N), out_dtype),
        grid=grid,
        in_specs=[
            pl.BlockSpec((tm, tk), x_map),   # activations, bf16
            pl.BlockSpec((tk, tn), w_map),   # weight [H_in, H_out] tile, bf16
            pl.BlockSpec((1, tn), b_map),    # bias, f32
        ],
        out_specs=pl.BlockSpec((tm, tn), o_map),
        scratch_shapes=[pltpu.VMEM((tm, tn), jnp.float32)],
        compiler_params=pltpu.CompilerParams(
            dimension_semantics=("parallel", "parallel", "arbitrary"),
            vmem_limit_bytes=vmem_limit,
        ),
        cost_estimate=cost,
    )(x2d, w_t, b2d)

    return out2d.reshape(B, S, N)


if __name__ == "__main__":
    B, S, H = 2, 8, 32

    key = jax.random.PRNGKey(0)
    kx, kw, kb = jax.random.split(key, 3)

    x = jax.random.normal(kx, (B, S, H), dtype=jnp.float32)
    # Deterministic "nn.Linear(H, H)" parameters (uniform +/- 1/sqrt(fan_in)),
    # torch layout [out_features, in_features].
    bound = 1.0 / jnp.sqrt(jnp.float32(H))
    weight = jax.random.uniform(kw, (H, H), jnp.float32, -bound, bound)
    bias = jax.random.uniform(kb, (H,), jnp.float32, -bound, bound)

    out = worker_module_forward(x, weight, bias)
    jax.block_until_ready(out)

    # Reference matching the kernel's bf16-operand / f32-accumulate numerics.
    x2d = x.reshape(B * S, H)
    ref_bf16 = lax.dot_general(
        x2d.astype(jnp.bfloat16), weight.astype(jnp.bfloat16),
        dimension_numbers=(((1,), (1,)), ((), ())),
        preferred_element_type=jnp.float32) + bias
    ref_bf16 = ref_bf16.reshape(B, S, H).astype(x.dtype)
    assert jnp.allclose(out, ref_bf16, atol=1e-3, rtol=1e-3), \
        "mismatch vs bf16-matched reference"

    # Sanity check against the full-f32 local_net(x) semantics (looser tol
    # because the MXU operands are rounded to bf16).
    ref_f32 = (x2d @ weight.T + bias).reshape(B, S, H)
    assert jnp.allclose(out, ref_f32, atol=5e-2, rtol=5e-2), \
        "mismatch vs f32 reference"

    print("KERNEL_OK")
</pallas_src>

<mosaic_0001>
module attributes {stable_mosaic.version = 11 : i64} {
  func.func @_linear_kernel(%arg0: i32, %arg1: i32, %arg2: i32, %arg3: memref<16x32xbf16, #tpu.memory_space<vmem>>, %arg4: memref<32x32xbf16, #tpu.memory_space<vmem>>, %arg5: memref<1x32xf32, #tpu.memory_space<vmem>>, %arg6: memref<16x32xf32, #tpu.memory_space<vmem>>, %arg7: memref<16x32xf32, #tpu.memory_space<vmem>>) attributes {dimension_semantics = [#tpu.dimension_semantics<parallel>, #tpu.dimension_semantics<parallel>, #tpu.dimension_semantics<arbitrary>], iteration_bounds = array<i64: 1, 1, 1>, scalar_prefetch = 0 : i64, scratch_operands = 1 : i64, tpu.core_type = #tpu.core_type<tc>, window_params = [{transform_indices = @transform_0, window_bounds = array<i64: 16, 32>}, {transform_indices = @transform_1, window_bounds = array<i64: 32, 32>}, {transform_indices = @transform_2, window_bounds = array<i64: 1, 32>}, {transform_indices = @transform_3, window_bounds = array<i64: 16, 32>}]} {
    %c0_i32 = arith.constant 0 : i32
    %0 = arith.cmpi eq, %arg2, %c0_i32 : i32
    %1 = arith.extui %0 : i1 to i32
    %c0_i32_0 = arith.constant 0 : i32
    %2 = arith.cmpi ne, %1, %c0_i32_0 : i32
    scf.if %2 {
      %cst_10 = arith.constant 0.000000e+00 : f32
      %12 = vector.broadcast %cst_10 : f32 to vector<16x32xf32>
      %c0_11 = arith.constant 0 : index
      %c0_12 = arith.constant 0 : index
      %13 = vector.load %arg7[%c0_11, %c0_12] : memref<16x32xf32, #tpu.memory_space<vmem>>, vector<16x32xf32>
      tpu.vector_store %arg7[%c0_11, %c0_12], %12 {strides = array<i32>} : memref<16x32xf32, #tpu.memory_space<vmem>>, vector<16x32xf32>,
    } else {
    }
    %c0 = arith.constant 0 : index
    %c0_1 = arith.constant 0 : index
    %3 = vector.load %arg7[%c0, %c0_1] : memref<16x32xf32, #tpu.memory_space<vmem>>, vector<16x32xf32>
    %c0_2 = arith.constant 0 : index
    %c0_3 = arith.constant 0 : index
    %4 = vector.load %arg3[%c0_2, %c0_3] : memref<16x32xbf16, #tpu.memory_space<vmem>>, vector<16x32xbf16>
    %c0_4 = arith.constant 0 : index
    %c0_5 = arith.constant 0 : index
    %5 = vector.load %arg4[%c0_4, %c0_5] : memref<32x32xbf16, #tpu.memory_space<vmem>>, vector<32x32xbf16>
    %cst = arith.constant dense<0.000000e+00> : vector<16x32xf32>
    %6 = tpu.matmul %4, %5, %cst {dimension_numbers = #tpu.dot_dimension_numbers<[1], [0], [0], [1], [0, 0, 1, 1], [], []>} : vector<16x32xbf16>, vector<32x32xbf16>, vector<16x32xf32> -> vector<16x32xf32>
    %7 = arith.addf %3, %6 : vector<16x32xf32>
    %c0_6 = arith.constant 0 : index
    %c0_7 = arith.constant 0 : index
    %8 = vector.load %arg7[%c0_6, %c0_7] : memref<16x32xf32, #tpu.memory_space<vmem>>, vector<16x32xf32>
    tpu.vector_store %arg7[%c0_6, %c0_7], %7 {strides = array<i32>} : memref<16x32xf32, #tpu.memory_space<vmem>>, vector<16x32xf32>,
    %c0_i32_8 = arith.constant 0 : i32
    %9 = arith.cmpi eq, %arg2, %c0_i32_8 : i32
    %10 = arith.extui %9 : i1 to i32
    %c0_i32_9 = arith.constant 0 : i32
    %11 = arith.cmpi ne, %10, %c0_i32_9 : i32
    scf.if %11 {
      %c0_10 = arith.constant 0 : index
      %c0_11 = arith.constant 0 : index
      %12 = vector.load %arg7[%c0_10, %c0_11] : memref<16x32xf32, #tpu.memory_space<vmem>>, vector<16x32xf32>
      %c0_12 = arith.constant 0 : index
      %c0_13 = arith.constant 0 : index
      %13 = vector.load %arg5[%c0_12, %c0_13] : memref<1x32xf32, #tpu.memory_space<vmem>>, vector<1x32xf32>
      %14 = vector.broadcast %13 : vector<1x32xf32> to vector<16x32xf32>
      %15 = arith.addf %12, %14 : vector<16x32xf32>
      %c0_14 = arith.constant 0 : index
      %c0_15 = arith.constant 0 : index
      %16 = vector.load %arg6[%c0_14, %c0_15] : memref<16x32xf32, #tpu.memory_space<vmem>>, vector<16x32xf32>
      tpu.vector_store %arg6[%c0_14, %c0_15], %15 {strides = array<i32>} : memref<16x32xf32, #tpu.memory_space<vmem>>, vector<16x32xf32>,
    } else {
    }
    return
  }
  func.func @transform_0(%arg0: i32, %arg1: i32, %arg2: i32) -> (i32, i32) {
    %c0_i32 = arith.constant 0 : i32
    return %arg0, %arg2 : i32, i32
  }
  func.func @transform_1(%arg0: i32, %arg1: i32, %arg2: i32) -> (i32, i32) {
    %c0_i32 = arith.constant 0 : i32
    return %arg2, %arg1 : i32, i32
  }
  func.func @transform_2(%arg0: i32, %arg1: i32, %arg2: i32) -> (i32, i32) {
    %c0_i32 = arith.constant 0 : i32
    %c0_i32_0 = arith.constant 0 : i32
    return %c0_i32, %arg1 : i32, i32
  }
  func.func @transform_3(%arg0: i32, %arg1: i32, %arg2: i32) -> (i32, i32) {
    %c0_i32 = arith.constant 0 : i32
    return %arg0, %arg1 : i32, i32
  }
}

</mosaic_0001>

<bundles_post_ra>
// kernel: worker_module_forward.1
= control target key start
LH: loop header
LB: loop body
LE: loop exit
PB: predicated region body
PF: predicated region fallthrough
CT: control target
= control target key end

     0   :  { %v175_v1 = vmov 0.0   ;;  %vm176_vm0 = vmmov 0   ;;  %vm20_vm1 = vcmask 261120   ;;  %s222_s0 = inlined_call_operand.vmem [shape: bf16[16,32], index: 0, kind: input, shape index: {}]   ;;  %s223_s1 = inlined_call_operand.vmem [shape: bf16[32,32], index: 1, kind: input, shape index: {}]   ;;  %s224_s2 = inlined_call_operand.vmem [shape: f32[1,32], index: 2, kind: input, shape index: {}]   ;;  %s225_s3 = inlined_call_operand.hbm [shape: f32[16,32], index: 3, kind: output, shape index: {}]  }
   0x1   :  { %v150_v0 = vld [vmem:[%s223_s1 + $0x8] sm:$0xff]   ;;  %137 = vmatprep.subr.bf16.mxu0 %v175_v1  ;;  %v151_v2 = vld [vmem:[%s223_s1] sm:$0xff]   ;;  %141 = vmatprep.mubr.msk.bf16.mxu0 %vm176_vm0, %v175_v1  ;;  %21 = vst.msk [vmem:[#allocation2] sm:$0xff] %vm20_vm1, %v175_v1  ;;  %22 = vst.msk [vmem:[#allocation2 + $0x8] sm:$0xff] %vm20_vm1, %v175_v1 }
   0x2   :  { %138 = vmatpush3.bf16.msra.mxu0 %v150_v0 }
   0x3   :  { %139 = vmatprep.subr.bf16.mxu0 %v175_v1 }
   0x4   :  { %8 = vsyncpa [#allocation4], 0  ;;  %v152_v3 = vld [vmem:[%s222_s0] sm:$0xff]   ;;  %s177_s0 = smov [#allocation3]  }
   0x5   :  { %v133_v12 = vld [vmem:[%s224_s2] ss:$0 sm:$0xff]  ;;  %s118_s19 = sshll.u32 %s177_s0, 4  ;;  %s119_s19 = int_to_ptr.vmem [resolvable:$true] %s118_s19 }
   0x6   :  { %140 = vmatpush3.bf16.msra.mxu0 %v151_v2  ;;  %s153_s20 = scalar_lea.vmem %s119_s19, 256  ;;  %p158_p1 = scmp.lt.s32.totalorder %s119_s19, %s119_s19 }
   0x7   :  { %p154_p0 = scmp.ne.s32.totalorder %s119_s19, %s153_s20  ;;  %p159_p2 = scmp.lt.s32.totalorder %s153_s20, %s153_s20 }
   0x8   :  { %v23_v4 = vld [vmem:[#allocation2] sm:$0xff]  ;;  %v24_v8 = vld [vmem:[#allocation2 + $0x8] sm:$0xff] }
   0x9   :  { %142 = vmatmul.mubr.msk.bf16.vlgmr.msra.gmra.mxu0 %vm20_vm1, %v152_v3  ;;  %p160_p3 = por %p159_p2, %p158_p1 }
   0xb   :  { %p161_p4 = pnand %p160_p3, %p154_p0 }
  0xc9   :  { %v86_v5 = vpop.f32.mrf.mxu0 }
  0xca   :  { %v93_v6 = vadd.f32 %v86_v5, %v23_v4 }
  0xcb   :  { %v143_v7 = vpop.f32.mrf.mxu0 }
  0xcc   :  { %95 = vst.msk [vmem:[#allocation2] sm:$0xff] %vm20_vm1, %v93_v6 }
  0xcd   :  { %v89_v9 = vpop.f32.mrf.mxu0 }
  0xce   :  { %v94_v10 = vadd.f32 %v89_v9, %v24_v8 }
  0xcf   :  { %v144_v11 = vpop.f32.mrf.mxu0 }
  0xd0   :  { %96 = vst.msk [vmem:[#allocation2 + $0x8] sm:$0xff] %vm20_vm1, %v94_v10 }
  0xd3   :  { %v100_v13 = vld [vmem:[#allocation2] sm:$0xff] }
  0xd4   :  { %v109_v14 = vadd.f32 %v133_v12, %v100_v13 }
  0xd6   :  { %111 = vst.msk [vmem:[#allocation3] sm:$0xff] %vm20_vm1, %v109_v14 }
  0xd7   :  { %v101_v15 = vld [vmem:[#allocation2 + $0x8] sm:$0xff] }
  0xd8   :  { %v110_v16 = vadd.f32 %v133_v12, %v101_v15 }
  0xda   :  { %112 = vst.msk [vmem:[#allocation3 + $0x8] sm:$0xff] %vm20_vm1, %v110_v16 }
  0xdb   :  { %164 = shalt.err (!%p161_p4)
}
  0xdc   :  { %s178_s21 = smov 128   ;;  %s179_s2 = smov 8  }
  0xdd   :  { %124 = dma.vmem_to_hbm [thread:$0]  %s119_s19, 256, %s225_s3, [#allocation4], %s178_s21, %s178_s21, %s179_s2  }
  0xde   :  { %173 = dma.done.wait [#allocation4], 256  }
  0xdf   :  { %174 = vsyncadd [#allocation4], 4294967040 }
  0xe0   :  { %128 = vsyncpa [#allocation4], 1 }

</bundles_post_ra>
